<compile_context>
chip_gen: v7x
topology: tpu7x:2x2x1
jax: 0.10.0
libtpu: 0.0.40
codegen_flags: <defaults>
</compile_context>

<pallas_src>
import functools
import math

import jax
import jax.numpy as jnp
from jax.experimental import pallas as pl
from jax.experimental.pallas import tpu as pltpu


def _round_up(a: int, b: int) -> int:
    return (a + b - 1) // b * b


def _cdiv(a: int, b: int) -> int:
    return -(-a // b)


# --------------------------------------------------------------------------
# Shared elementwise math (fp32 in-register)
# --------------------------------------------------------------------------
def _ssc_elementwise(x, leak, mode: str):
    ax = jnp.abs(x)                      # reused for |x_leak| and log1p(|x|)
    x_leak = x * leak
    if mode == "gating":
        gate = x_leak
    else:                                # dampening: |x * leak| == |x| * |leak|
        gate = ax * jnp.abs(leak)
    # sigmoid(x) == 0.5 * (tanh(0.5 x) + 1): one EUP op instead of exp + recip.
    x_a = 0.5 * jnp.tanh(0.5 * x) + 0.5 + gate
    # siglog(x) = sign(x) * log1p(|x|): copysign-style, no extra multiply.
    mag = jnp.log1p(ax)
    x_b = jnp.where(x < 0.0, -mag, mag) + x_leak
    return x_a * x_b


def _finalize_plain(y, o_ref, eps: float):
    denom = jnp.mean(jnp.abs(y), axis=-1, keepdims=True) + eps
    o_ref[...] = (y * jax.lax.rsqrt(denom)).astype(o_ref.dtype)


def _finalize_packed(y, red_ref, bc_ref, o_ref, eps: float):
    # Segmented mean over each D-wide lane group via the (idle) MXU.
    # HIGHEST precision so the normalization denominator stays at f32
    # precision (DEFAULT would round the operands to bf16).
    hi = jax.lax.Precision.HIGHEST
    seg_mean = jnp.dot(jnp.abs(y), red_ref[...],
                       preferred_element_type=jnp.float32, precision=hi)
    inv = jax.lax.rsqrt(seg_mean + eps)          # rsqrt only on the (tm, k) slab
    inv_b = jnp.dot(inv, bc_ref[...],
                    preferred_element_type=jnp.float32, precision=hi)
    o_ref[...] = (y * inv_b).astype(o_ref.dtype)


# --------------------------------------------------------------------------
# Kernels: {plain, packed} x {baked-constant leak, trainable SMEM leak}
# --------------------------------------------------------------------------
def _ssc_kernel_const(x_ref, o_ref, *, leak: float, mode: str, eps: float):
    x = x_ref[...].astype(jnp.float32)
    _finalize_plain(_ssc_elementwise(x, jnp.float32(leak), mode), o_ref, eps)


def _ssc_kernel_smem(leak_ref, x_ref, o_ref, *, mode: str, eps: float):
    x = x_ref[...].astype(jnp.float32)
    _finalize_plain(_ssc_elementwise(x, leak_ref[0], mode), o_ref, eps)


def _ssc_packed_kernel_const(x_ref, red_ref, bc_ref, o_ref, *,
                             leak: float, mode: str, eps: float):
    x = x_ref[...].astype(jnp.float32)
    _finalize_packed(_ssc_elementwise(x, jnp.float32(leak), mode),
                     red_ref, bc_ref, o_ref, eps)


def _ssc_packed_kernel_smem(leak_ref, x_ref, red_ref, bc_ref, o_ref, *,
                            mode: str, eps: float):
    x = x_ref[...].astype(jnp.float32)
    _finalize_packed(_ssc_elementwise(x, leak_ref[0], mode),
                     red_ref, bc_ref, o_ref, eps)


# --------------------------------------------------------------------------
# Module-like wrapper
# --------------------------------------------------------------------------
class SignalStabilizationCompressor:
    def __init__(
        self,
        bgn_input: bool = False,
        bgn_mid: bool = False,
        bgn_output: bool = False,
        mode: str = "gating",
        trainable: bool = False,
        leak: float = 1e-3,
        eps: float = 1e-12,
    ):
        mode = getattr(mode, "value", mode)
        assert mode in ("gating", "dampening")
        self.bgn_input = bgn_input    # forward-identity; see TODO at top
        self.bgn_mid = bgn_mid
        self.bgn_output = bgn_output
        self.mode = mode
        self.trainable = trainable
        self.leak = leak
        self.eps = eps
        if self.trainable:
            # matches torch.tensor([1.0])
            self.leak_scale = jnp.array([1.0], dtype=jnp.float32)

    def __call__(self, x: jnp.ndarray) -> jnp.ndarray:
        orig_shape = x.shape
        D = int(orig_shape[-1])
        R = 1
        for s in orig_shape[:-1]:
            R *= int(s)
        if R == 0:
            return x

        # precision handling matches the torch module
        precision_pass = x.dtype in (jnp.bfloat16, jnp.float32)
        eps = self.eps if precision_pass else float(jnp.finfo(x.dtype).tiny)
        leak = self.leak if precision_pass else math.sqrt(eps)

        # ---- lane-dense packing for narrow feature dims ---------------------
        # Only when it is a pure row-major regroup (D divides 128 and the row
        # count divides by the pack factor) so the reshape is free -- no
        # host-side pad/concatenate (that would add a full extra HBM pass
        # around an already HBM-bound kernel).
        k = 1
        if D < 128 and 128 % D == 0 and R % (128 // D) == 0:
            k = 128 // D
        # TODO(synk): D that is not a divisor of 128 (48, 96, 200, ...) still
        # takes the plain (masked-store) path; packing those would need a
        # host-side column pad, reintroducing the extra HBM pass removed here.
        P = k * D
        rp = R // k
        x2 = x.reshape(rp, P)         # contiguous row-major regroup: no copy

        # ---- row-tile selection (kernel is HBM-bandwidth bound) -------------
        target_block_bytes = 2 << 20       # >=1 MiB blocks already ~85% of roofline
        row_bytes = P * 4                  # budget against fp32 intermediates
        rp8 = _round_up(rp, 8)
        tm = max(8, min((target_block_bytes // row_bytes) // 8 * 8, rp8))
        # Keep >= 4 grid steps when there is enough data: >= 2 per TensorCore
        # on the v7x megacore, 3-4 on v5e/v6e, so the prologue/epilogue DMA is
        # hidden behind compute instead of fully exposed.
        min_steps = 4
        if _cdiv(rp, tm) < min_steps and rp >= min_steps * 8:
            tm = max(8, (rp // min_steps) // 8 * 8)
        # Partial last block: Pallas masks boundary writes, garbage rows never
        # land in valid output rows (per-row math only) -> no padding needed.
        grid = (_cdiv(rp, tm),)

        tile_f32_bytes = tm * P * 4
        # ~2x in + 2x out (double-buffered) + a few fp32 temps; stay well below
        # the 64 MiB v7x physical per-core VMEM so the compiler keeps headroom.
        vmem_limit = int(min(48 << 20, max(16 << 20, 8 * tile_f32_bytes)))
        # TODO(synk): extremely wide D (a single 8-row block exceeding the VMEM
        # budget) would need a second "arbitrary" grid axis over D with a
        # scratch accumulator for sum(|y|); not implemented.
        cparams = pltpu.CompilerParams(
            dimension_semantics=("parallel",),
            vmem_limit_bytes=vmem_limit,
        )

        out_shape = jax.ShapeDtypeStruct((rp, P), x.dtype)
        x_spec = pl.BlockSpec((tm, P), lambda i: (i, 0))
        o_spec = pl.BlockSpec((tm, P), lambda i: (i, 0))
        smem_spec = pl.BlockSpec(memory_space=pltpu.MemorySpace.SMEM)

        if self.trainable:
            # torch: x * self.leak * softplus(leak_scale)
            leak_op = (self.leak
                       * jax.nn.softplus(self.leak_scale.astype(jnp.float32)))
            leak_op = leak_op.reshape((1,)).astype(jnp.float32)

        if k > 1:
            seg = jnp.arange(P, dtype=jnp.int32) // D                 # (P,)
            grp = jnp.arange(k, dtype=jnp.int32)                      # (k,)
            # reduce: (P, k) {0, 1/D} matrix -> per-group mean (inv_d folded in)
            reduce_mat = jnp.where(seg[:, None] == grp[None, :],
                                   jnp.float32(1.0 / D),
                                   jnp.float32(0.0)).astype(jnp.float32)
            # broadcast: (k, P) 0/1 matrix -> group value back across its lanes
            bcast_mat = (grp[:, None] == seg[None, :]).astype(jnp.float32)
            red_spec = pl.BlockSpec((P, k), lambda i: (0, 0))
            bc_spec = pl.BlockSpec((k, P), lambda i: (0, 0))
            if self.trainable:
                kernel = functools.partial(_ssc_packed_kernel_smem,
                                           mode=self.mode, eps=eps)
                out = pl.pallas_call(
                    kernel, out_shape=out_shape, grid=grid,
                    in_specs=[smem_spec, x_spec, red_spec, bc_spec],
                    out_specs=o_spec, compiler_params=cparams,
                )(leak_op, x2, reduce_mat, bcast_mat)
            else:
                kernel = functools.partial(_ssc_packed_kernel_const,
                                           leak=float(leak), mode=self.mode,
                                           eps=eps)
                out = pl.pallas_call(
                    kernel, out_shape=out_shape, grid=grid,
                    in_specs=[x_spec, red_spec, bc_spec],
                    out_specs=o_spec, compiler_params=cparams,
                )(x2, reduce_mat, bcast_mat)
        else:
            if self.trainable:
                kernel = functools.partial(_ssc_kernel_smem,
                                           mode=self.mode, eps=eps)
                out = pl.pallas_call(
                    kernel, out_shape=out_shape, grid=grid,
                    in_specs=[smem_spec, x_spec],
                    out_specs=o_spec, compiler_params=cparams,
                )(leak_op, x2)
            else:
                kernel = functools.partial(_ssc_kernel_const,
                                           leak=float(leak), mode=self.mode,
                                           eps=eps)
                out = pl.pallas_call(
                    kernel, out_shape=out_shape, grid=grid,
                    in_specs=[x_spec],
                    out_specs=o_spec, compiler_params=cparams,
                )(x2)

        return out.reshape(orig_shape)


# --------------------------------------------------------------------------
# Pure-JAX reference (mirrors the PyTorch forward exactly)
# --------------------------------------------------------------------------
def _reference(x, mode="gating", trainable=False, leak=1e-3, eps=1e-12,
               leak_scale=None):
    x = x.astype(jnp.float32)
    if trainable:
        x_leak = x * leak * jax.nn.softplus(leak_scale.astype(x.dtype))
    else:
        x_leak = x * leak
    gate = x_leak if mode == "gating" else jnp.abs(x_leak)
    x_a = jax.nn.sigmoid(x) + gate
    x_b = jnp.sign(x) * jnp.log1p(jnp.abs(x)) + x_leak
    y = x_a * x_b
    denom = jnp.mean(jnp.abs(y), axis=-1, keepdims=True) + eps
    return y * jax.lax.rsqrt(denom)


if __name__ == "__main__":
    key = jax.random.PRNGKey(0)
    k1, k2, k3 = jax.random.split(key, 3)

    # Case 1: narrow feature dim (lane-packed path), gating / non-trainable.
    x1 = jax.random.normal(k1, (2, 4, 16, 16), dtype=jnp.float32) * 3.0
    m1 = SignalStabilizationCompressor(mode="gating", trainable=False)
    o1 = jax.block_until_ready(m1(x1))
    r1 = _reference(x1, mode="gating")
    assert o1.shape == x1.shape and o1.dtype == x1.dtype
    assert jnp.allclose(o1, r1, atol=1e-4, rtol=1e-4), (
        float(jnp.max(jnp.abs(o1 - r1))))

    # Case 2: wide feature dim (plain path), dampening / trainable (SMEM leak).
    x2 = jax.random.normal(k2, (2, 8, 256), dtype=jnp.float32) * 3.0
    m2 = SignalStabilizationCompressor(mode="dampening", trainable=True)
    o2 = jax.block_until_ready(m2(x2))
    r2 = _reference(x2, mode="dampening", trainable=True,
                    leak_scale=jnp.array([1.0], jnp.float32))
    assert o2.shape == x2.shape and o2.dtype == x2.dtype
    assert jnp.allclose(o2, r2, atol=1e-4, rtol=1e-4), (
        float(jnp.max(jnp.abs(o2 - r2))))

    # Case 3: ragged row count -> multi-step grid with a partial last block
    # (no host-side padding / output slicing anywhere).
    x3 = jax.random.normal(k3, (5, 13, 32), dtype=jnp.float32) * 2.0
    m3 = SignalStabilizationCompressor(mode="gating", trainable=False)
    o3 = jax.block_until_ready(m3(x3))
    r3 = _reference(x3, mode="gating")
    assert o3.shape == x3.shape and o3.dtype == x3.dtype
    assert jnp.allclose(o3, r3, atol=1e-4, rtol=1e-4), (
        float(jnp.max(jnp.abs(o3 - r3))))

    print("KERNEL_OK")
</pallas_src>

<mosaic_0001>
module attributes {stable_mosaic.version = 11 : i64} {
  func.func @_ssc_packed_kernel_const(%arg0: i32, %arg1: memref<16x128xf32, #tpu.memory_space<vmem>>, %arg2: memref<128x8xf32, #tpu.memory_space<vmem>>, %arg3: memref<8x128xf32, #tpu.memory_space<vmem>>, %arg4: memref<16x128xf32, #tpu.memory_space<vmem>>) attributes {dimension_semantics = [#tpu.dimension_semantics<parallel>], iteration_bounds = array<i64: 1>, scalar_prefetch = 0 : i64, scratch_operands = 0 : i64, tpu.core_type = #tpu.core_type<tc>, window_params = [{transform_indices = @transform_0, window_bounds = array<i64: 16, 128>}, {pipeline_mode = #tpu.pipeline_mode<synchronous>, transform_indices = @transform_1, window_bounds = array<i64: 128, 8>}, {pipeline_mode = #tpu.pipeline_mode<synchronous>, transform_indices = @transform_2, window_bounds = array<i64: 8, 128>}, {transform_indices = @transform_3, window_bounds = array<i64: 16, 128>}]} {
    %c0 = arith.constant 0 : index
    %c0_0 = arith.constant 0 : index
    %0 = vector.load %arg1[%c0, %c0_0] : memref<16x128xf32, #tpu.memory_space<vmem>>, vector<16x128xf32>
    %1 = math.absf %0 : vector<16x128xf32>
    %cst = arith.constant 1.000000e-03 : f32
    %2 = vector.broadcast %cst : f32 to vector<16x128xf32>
    %3 = arith.mulf %0, %2 : vector<16x128xf32>
    %cst_1 = arith.constant 5.000000e-01 : f32
    %4 = vector.broadcast %cst_1 : f32 to vector<16x128xf32>
    %5 = arith.mulf %4, %0 : vector<16x128xf32>
    %6 = math.tanh %5 : vector<16x128xf32>
    %cst_2 = arith.constant 5.000000e-01 : f32
    %7 = vector.broadcast %cst_2 : f32 to vector<16x128xf32>
    %8 = arith.mulf %7, %6 : vector<16x128xf32>
    %cst_3 = arith.constant 5.000000e-01 : f32
    %9 = vector.broadcast %cst_3 : f32 to vector<16x128xf32>
    %10 = arith.addf %8, %9 : vector<16x128xf32>
    %11 = arith.addf %10, %3 : vector<16x128xf32>
    %12 = math.log1p %1 : vector<16x128xf32>
    %cst_4 = arith.constant 0.000000e+00 : f32
    %13 = vector.broadcast %cst_4 : f32 to vector<16x128xf32>
    %14 = arith.cmpf olt, %0, %13 : vector<16x128xf32>
    %cst_5 = arith.constant 0.000000e+00 : f32
    %15 = vector.broadcast %cst_5 : f32 to vector<16x128xf32>
    %16 = arith.subf %15, %12 : vector<16x128xf32>
    %17 = arith.select %14, %16, %12 : vector<16x128xi1>, vector<16x128xf32>
    %18 = arith.addf %17, %3 : vector<16x128xf32>
    %19 = arith.mulf %11, %18 : vector<16x128xf32>
    %20 = math.absf %19 : vector<16x128xf32>
    %c0_6 = arith.constant 0 : index
    %c0_7 = arith.constant 0 : index
    %21 = vector.load %arg2[%c0_6, %c0_7] : memref<128x8xf32, #tpu.memory_space<vmem>>, vector<128x8xf32>
    %cst_8 = arith.constant dense<0.000000e+00> : vector<16x8xf32>
    %22 = tpu.matmul %20, %21, %cst_8 {dimension_numbers = #tpu.dot_dimension_numbers<[1], [0], [0], [1], [0, 0, 1, 1], [], []>, precision = #tpu.contract_precision<fp32>} : vector<16x128xf32>, vector<128x8xf32>, vector<16x8xf32> -> vector<16x8xf32>
    %cst_9 = arith.constant 9.99999996E-13 : f32
    %23 = vector.broadcast %cst_9 : f32 to vector<16x8xf32>
    %24 = arith.addf %22, %23 : vector<16x8xf32>
    %25 = math.rsqrt %24 : vector<16x8xf32>
    %c0_10 = arith.constant 0 : index
    %c0_11 = arith.constant 0 : index
    %26 = vector.load %arg3[%c0_10, %c0_11] : memref<8x128xf32, #tpu.memory_space<vmem>>, vector<8x128xf32>
    %cst_12 = arith.constant dense<0.000000e+00> : vector<16x128xf32>
    %27 = tpu.matmul %25, %26, %cst_12 {dimension_numbers = #tpu.dot_dimension_numbers<[1], [0], [0], [1], [0, 0, 1, 1], [], []>, precision = #tpu.contract_precision<fp32>} : vector<16x8xf32>, vector<8x128xf32>, vector<16x128xf32> -> vector<16x128xf32>
    %28 = arith.mulf %19, %27 : vector<16x128xf32>
    %c0_13 = arith.constant 0 : index
    %c0_14 = arith.constant 0 : index
    %29 = vector.load %arg4[%c0_13, %c0_14] : memref<16x128xf32, #tpu.memory_space<vmem>>, vector<16x128xf32>
    tpu.vector_store %arg4[%c0_13, %c0_14], %28 {strides = array<i32>} : memref<16x128xf32, #tpu.memory_space<vmem>>, vector<16x128xf32>,
    return
  }
  func.func @transform_0(%arg0: i32) -> (i32, i32) {
    %c0_i32 = arith.constant 0 : i32
    %c0_i32_0 = arith.constant 0 : i32
    return %arg0, %c0_i32 : i32, i32
  }
  func.func @transform_1(%arg0: i32) -> (i32, i32) {
    %c0_i32 = arith.constant 0 : i32
    %c0_i32_0 = arith.constant 0 : i32
    %c0_i32_1 = arith.constant 0 : i32
    return %c0_i32, %c0_i32_0 : i32, i32
  }
  func.func @transform_2(%arg0: i32) -> (i32, i32) {
    %c0_i32 = arith.constant 0 : i32
    %c0_i32_0 = arith.constant 0 : i32
    %c0_i32_1 = arith.constant 0 : i32
    return %c0_i32, %c0_i32_0 : i32, i32
  }
  func.func @transform_3(%arg0: i32) -> (i32, i32) {
    %c0_i32 = arith.constant 0 : i32
    %c0_i32_0 = arith.constant 0 : i32
    return %arg0, %c0_i32 : i32, i32
  }
}

</mosaic_0001>

<bundles_post_ra>
// kernel: tpu_custom_call.1
= control target key start
LH: loop header
LB: loop body
LE: loop exit
PB: predicated region body
PF: predicated region fallthrough
CT: control target
= control target key end

     0   :  { %s2301_s0 = inlined_call_operand.vmem [shape: f32[16,128], index: 0, kind: input, shape index: {}]   ;;  %s2302_s1 = inlined_call_operand.vmem [shape: f32[128,8], index: 1, kind: input, shape index: {}]   ;;  %s2303_s2 = inlined_call_operand.vmem [shape: f32[8,128], index: 2, kind: input, shape index: {}]   ;;  %s2304_s3 = inlined_call_operand.hbm [shape: f32[16,128], index: 3, kind: output, shape index: {}]  }
   0x1   :  { %v61_v0 = vld [vmem:[%s2302_s1] sm:$0xff]  ;;  %v62_v1 = vld [vmem:[%s2302_s1 + $0x8] sm:$0xff]  ;;  %v1931_v2 = vld [vmem:[%s2302_s1 + $0x10] sm:$0xff] }
   0x2   :  { %v78_v3 = vand.u32 4294901760, %v61_v0  ;;  %v81_v4 = vand.u32 4294901760, %v62_v1  ;;  %v1936_v5 = vld [vmem:[%s2302_s1 + $0x18] sm:$0xff]  ;;  %v84_v6 = vand.u32 4294901760, %v1931_v2  ;;  %v1942_v7 = vld [vmem:[%s2302_s1 + $0x20] sm:$0xff]  ;;  %v1947_v8 = vld [vmem:[%s2302_s1 + $0x28] sm:$0xff] }
   0x3   :  { %v87_v9 = vand.u32 4294901760, %v1936_v5  ;;  %v90_v11 = vand.u32 4294901760, %v1942_v7  ;;  %v93_v12 = vand.u32 4294901760, %v1947_v8  ;;  %v1963_v14 = vld [vmem:[%s2302_s1 + $0x30] sm:$0xff]  ;;  %v1968_v15 = vld [vmem:[%s2302_s1 + $0x38] sm:$0xff]  ;;  %v1975_v16 = vld [vmem:[%s2301_s0] sm:$0xff] }
   0x4   :  { %v1950_v10 = vpack.c.bf16 %v81_v4, %v78_v3  ;;  %v1980_v17 = vand.u32 2147483647, %v1975_v16 }
   0x5   :  { %v1958_v13 = vpack.c.bf16 %v87_v9, %v84_v6 }
   0x6   :  { %1743 = vmatprep.subr.bf16.mxu0 %v1950_v10  ;;  %1647 = vmatprep.subr.bf16.mxu1 %v1950_v10 }
   0x7   :  { %1745 = vmatpush3.bf16.msra.mxu0 %v1950_v10  ;;  %1649 = vmatpush3.bf16.msra.mxu1 %v1950_v10 }
   0x8   :  { %8 = vsyncpa [#allocation3], 0  ;;  %1747 = vmatprep.subr.bf16.mxu0 %v1958_v13  ;;  %1651 = vmatprep.subr.bf16.mxu1 %v1958_v13  ;;  %v1988_v18 = vpack.c.bf16 %v93_v12, %v90_v11  ;;  %v96_v19 = vand.u32 4294901760, %v1963_v14  ;;  %v99_v20 = vand.u32 4294901760, %v1968_v15  ;;  %v1995_v21 = vld [vmem:[%s2302_s1 + $0x40] sm:$0xff]  ;;  %v21_v22 = vmul.f32 0.5, %v1975_v16 }
   0x9   :  { %v2001_v23 = vld [vmem:[%s2301_s0 + $0x8] sm:$0xff]  ;;  %v31_v25 = vadd.f32 1.0, %v1980_v17  ;;  %v102_v26 = vand.u32 4294901760, %v1995_v21  ;;  %v2027_v30 = vld [vmem:[%s2302_s1 + $0x50] sm:$0xff]  ;;  %v2032_v31 = vld [vmem:[%s2302_s1 + $0x58] sm:$0xff]  ;;  %v34_v32 = vmul.f32 -0.5, %v1980_v17  ;;  %v2041_v37 = vsub.f32 %v61_v0, %v78_v3 }
   0xa   :  { %v2006_v24 = vld [vmem:[%s2302_s1 + $0x48] sm:$0xff]  ;;  %1863 = vtanh.f32 %v21_v22  ;;  %v2013_v27 = vand.u32 2147483647, %v2001_v23  ;;  %v2021_v28 = vpack.c.bf16 %v99_v20, %v96_v19  ;;  %v22_v33 = vmul.f32 0.5, %v2001_v23  ;;  %v2054_v39 = vld [vmem:[%s2302_s1 + $0x60] sm:$0xff]  ;;  %v2071_v46 = vld [vmem:[%s2302_s1 + $0x70] sm:$0xff] }
   0xb   :  { %1749 = vmatpush3.bf16.msra.mxu0 %v1958_v13  ;;  %1653 = vmatpush3.bf16.msra.mxu1 %v1958_v13  ;;  %1865 = vlog2.f32 %v31_v25  ;;  %v105_v29 = vand.u32 4294901760, %v2006_v24  ;;  %v108_v35 = vand.u32 4294901760, %v2027_v30  ;;  %v111_v36 = vand.u32 4294901760, %v2032_v31  ;;  %v2059_v40 = vld [vmem:[%s2302_s1 + $0x68] sm:$0xff]  ;;  %v2085_v50 = vld [vmem:[%s2302_s1 + $0x78] sm:$0xff] }
   0xc   :  { %1751 = vmatprep.subr.bf16.mxu0 %v1988_v18  ;;  %1655 = vmatprep.subr.bf16.mxu1 %v1988_v18  ;;  %v40_v34 = vadd.f32 1.0, %v2013_v27  ;;  %1867 = vtanh.f32 %v22_v33  ;;  %v35_v41 = vadd.f32 1.0, %v34_v32  ;;  %v2061_v42 = vsub.f32 %v62_v1, %v81_v4 }
   0xd   :  { %v2049_v38 = vpack.c.bf16 %v105_v29, %v102_v26  ;;  %v43_v43 = vmul.f32 -0.5, %v2013_v27  ;;  %v114_v44 = vand.u32 4294901760, %v2054_v39  ;;  %v117_v45 = vand.u32 4294901760, %v2059_v40 }
   0xe   :  { %1869 = vlog2.f32 %v40_v34  ;;  %v181_v47 = vand.u32 4294901760, %v2041_v37  ;;  %v2080_v49 = vpack.c.bf16 %v111_v36, %v108_v35  ;;  %v36_v51 = vmul.f32 %v35_v41, %v1980_v17 }
   0xf   :  { %1753 = vmatpush3.bf16.msra.mxu0 %v1988_v18  ;;  %1657 = vmatpush3.bf16.msra.mxu1 %v1988_v18  ;;  %v188_v52 = vand.u32 4294901760, %v2061_v42  ;;  %v44_v53 = vadd.f32 1.0, %v43_v43  ;;  %vm38_vm0 = vcmp.lt.f32.partialorder %v1980_v17, 0.0004427343  ;;  %v120_v56 = vand.u32 4294901760, %v2071_v46 }
  0x10   :  { %1755 = vmatprep.subr.bf16.mxu0 %v2021_v28  ;;  %1659 = vmatprep.subr.bf16.mxu1 %v2021_v28  ;;  %v19_v57 = vmul.f32 0.001, %v1975_v16  ;;  %v2098_v59 = vpack.c.bf16 %v117_v45, %v114_v44  ;;  %v123_v60 = vand.u32 4294901760, %v2085_v50  ;;  %v182_v62 = vsub.f32 %v2041_v37, %v181_v47 }
  0x11   :  { %vm49_vm1 = vcmp.lt.f32.partialorder %v1975_v16, 0.0  ;;  %v189_v1 = vsub.f32 %v2061_v42, %v188_v52  ;;  %v45_v3 = vmul.f32 %v44_v53, %v2013_v27  ;;  %vm47_vm2 = vcmp.lt.f32.partialorder %v2013_v27, 0.0004427343 }
  0x12   :  { %v20_v32 = vmul.f32 0.001, %v2001_v23  ;;  %v2115_v16 = vpack.c.bf16 %v123_v60, %v120_v56  ;;  %vm50_vm3 = vcmp.lt.f32.partialorder %v2001_v23, 0.0  ;;  %v183_v43 = vand.u32 4294901760, %v182_v62 }
  0x13   :  { %1757 = vmatpush3.bf16.msra.mxu0 %v2021_v28  ;;  %1661 = vmatpush3.bf16.msra.mxu1 %v2021_v28  ;;  %v2130_v23 = vsub.f32 %v1936_v5, %v87_v9  ;;  %v1774_v62 = vpack.c.bf16 %v188_v52, %v181_v47  ;;  %v2145_v5 = vsub.f32 %v1947_v8, %v93_v12  ;;  %vm764_vm4 = vcmask 64512  }
  0x14   :  { %v1864_v48 = vpop.eup %1863  ;;  %1759 = vmatprep.subr.bf16.mxu0 %v2049_v38  ;;  %1663 = vmatprep.subr.bf16.mxu1 %v2049_v38  ;;  %v2167_v12 = vsub.f32 %v1968_v15, %v99_v20 }
  0x15   :  { %v1866_v54 = vpop.eup %1865  ;;  %v25_v55 = vmul.f32 0.5, %v1864_v48  ;;  %v190_v48 = vand.u32 4294901760, %v189_v1  ;;  %v202_v47 = vand.u32 4294901760, %v2130_v23 }
  0x16   :  { %v33_v58 = vmul.f32 0.6931472, %v1866_v54  ;;  %v1868_v63 = vpop.eup %1867  ;;  %v230_v20 = vand.u32 4294901760, %v2167_v12 }
  0x17   :  { %1761 = vmatpush3.bf16.msra.mxu0 %v2049_v38  ;;  %1665 = vmatpush3.bf16.msra.mxu1 %v2049_v38  ;;  %v27_v61 = vadd.f32 0.5, %v25_v55  ;;  %v26_v22 = vmul.f32 0.5, %v1868_v63  ;;  %v1678_v63 = vpack.c.bf16 %v190_v48, %v183_v43 }
  0x18   :  { %1763 = vmatprep.subr.bf16.mxu0 %v2080_v49  ;;  %1667 = vmatprep.subr.bf16.mxu1 %v2080_v49  ;;  %v39_v0 = vsel %vm38_vm0, %v36_v51, %v33_v58  ;;  %v1870_v4 = vpop.eup %1869  ;;  %v2125_v58 = vsub.f32 %v1931_v2, %v84_v6  ;;  %v2140_v6 = vsub.f32 %v1942_v7, %v90_v11 }
  0x19   :  { %v51_v17 = vsub.f32 0.0, %v39_v0  ;;  %v29_v25 = vadd.f32 %v27_v61, %v19_v57  ;;  %v42_v33 = vmul.f32 0.6931472, %v1870_v4  ;;  %v28_v41 = vadd.f32 0.5, %v26_v22 }
  0x1a   :  { %v195_v1 = vand.u32 4294901760, %v2125_v58  ;;  %v2162_v11 = vsub.f32 %v1963_v14, %v96_v19  ;;  %v209_v52 = vand.u32 4294901760, %v2140_v6 }
  0x1b   :  { %1765 = vmatpush3.bf16.msra.mxu0 %v2080_v49  ;;  %1669 = vmatpush3.bf16.msra.mxu1 %v2080_v49  ;;  %v53_v34 = vsel %vm49_vm1, %v51_v17, %v39_v0  ;;  %v48_v51 = vsel %vm47_vm2, %v45_v3, %v42_v33  ;;  %v30_v55 = vadd.f32 %v28_v41, %v20_v32  ;;  %v216_v3 = vand.u32 4294901760, %v2145_v5 }
  0x1c   :  { %1767 = vmatprep.subr.bf16.mxu0 %v2098_v59  ;;  %1671 = vmatprep.subr.bf16.mxu1 %v2098_v59  ;;  %v55_v27 = vadd.f32 %v53_v34, %v19_v57  ;;  %v52_v53 = vsub.f32 0.0, %v48_v51  ;;  %v196_v22 = vsub.f32 %v2125_v58, %v195_v1  ;;  %v223_v15 = vand.u32 4294901760, %v2162_v11 }
  0x1d   :  { %v210_v33 = vsub.f32 %v2140_v6, %v209_v52  ;;  %v217_v34 = vsub.f32 %v2145_v5, %v216_v3  ;;  %v2187_v41 = vsub.f32 %v1995_v21, %v102_v26  ;;  %v231_v21 = vsub.f32 %v2167_v12, %v230_v20 }
  0x1e   :  { %v2120_v54 = vmul.f32 %v55_v27, %v29_v25  ;;  %v54_v57 = vsel %vm50_vm3, %v52_v53, %v48_v51  ;;  %v203_v25 = vsub.f32 %v2130_v23, %v202_v47  ;;  %v2192_v27 = vsub.f32 %v2006_v24, %v105_v29 }
  0x1f   :  { %1769 = vmatpush3.bf16.msra.mxu0 %v2098_v59  ;;  %1673 = vmatpush3.bf16.msra.mxu1 %v2098_v59  ;;  %v56_v2 = vadd.f32 %v54_v57, %v20_v32  ;;  %v1778_v32 = vpack.c.bf16 %v202_v47, %v195_v1  ;;  %v197_v51 = vand.u32 4294901760, %v196_v22  ;;  %v237_v26 = vand.u32 4294901760, %v2187_v41 }
  0x20   :  { %1771 = vmatprep.subr.bf16.mxu0 %v2115_v16  ;;  %1675 = vmatprep.subr.bf16.mxu1 %v2115_v16  ;;  %v59_v61 = vand.u32 2147483647, %v2120_v54  ;;  %v204_v53 = vand.u32 4294901760, %v203_v25  ;;  %v244_v24 = vand.u32 4294901760, %v2192_v27  ;;  %v2203_v29 = vsub.f32 %v2027_v30, %v108_v35 }
  0x21   :  { %v2149_v0 = vmul.f32 %v56_v2, %v30_v55  ;;  %v1782_v55 = vpack.c.bf16 %v216_v3, %v209_v52  ;;  %v2208_v2 = vsub.f32 %v2032_v31, %v111_v36  ;;  %v1786_v52 = vpack.c.bf16 %v230_v20, %v223_v15 }
  0x22   :  { %v2147_v9 = vand.u32 4294901760, %v59_v61  ;;  %v1682_v47 = vpack.c.bf16 %v204_v53, %v197_v51  ;;  %v238_v30 = vsub.f32 %v2187_v41, %v237_v26  ;;  %v245_v35 = vsub.f32 %v2192_v27, %v244_v24 }
  0x23   :  { %1773 = vmatpush3.bf16.msra.mxu0 %v2115_v16  ;;  %1677 = vmatpush3.bf16.msra.mxu1 %v2115_v16  ;;  %v60_v8 = vand.u32 2147483647, %v2149_v0  ;;  %v251_v31 = vand.u32 4294901760, %v2203_v29  ;;  %v258_v36 = vand.u32 4294901760, %v2208_v2  ;;  %v2218_v25 = vsub.f32 %v2054_v39, %v114_v44 }
  0x24   :  { %v2156_v7 = vsub.f32 %v59_v61, %v2147_v9  ;;  %1775 = vmatprep.subr.bf16.mxu0 %v1774_v62  ;;  %1679 = vmatprep.subr.bf16.mxu1 %v1678_v63  ;;  %v224_v61 = vsub.f32 %v2162_v11, %v223_v15  ;;  %v239_v15 = vand.u32 4294901760, %v238_v30  ;;  %v246_v20 = vand.u32 4294901760, %v245_v35 }
  0x25   :  { %v2172_v17 = vand.u32 4294901760, %v60_v8  ;;  %v265_v39 = vand.u32 4294901760, %v2218_v25 }
  0x26   :  { %v160_v4 = vand.u32 4294901760, %v2156_v7  ;;  %v225_v3 = vand.u32 4294901760, %v224_v61 }
  0x27   :  { %v2178_v19 = vsub.f32 %v60_v8, %v2172_v17  ;;  %v218_v8 = vand.u32 4294901760, %v217_v34  ;;  %v259_v34 = vsub.f32 %v2208_v2, %v258_v36 }
  0x28   :  { %1543 = vmatprep.mubr.f32.mxu0 %v160_v4  ;;  %v161_v14 = vsub.f32 %v2156_v7, %v160_v4  ;;  %v232_v4 = vand.u32 4294901760, %v231_v21 }
  0x29   :  { %v170_v48 = vand.u32 4294901760, %v2178_v19  ;;  %v260_v53 = vand.u32 4294901760, %v259_v34 }
  0x2a   :  { %v162_v43 = vand.u32 4294901760, %v161_v14  ;;  %v1790_v14 = vpack.c.bf16 %v244_v24, %v237_v26 }
  0x2b   :  { %1544 = vmatmul.mubr.f32.vlgmr.msra.gmra.mrb[0].mxu0 %v170_v48  ;;  %v171_v57 = vsub.f32 %v2178_v19, %v170_v48  ;;  %v1794_v48 = vpack.c.bf16 %v258_v36, %v251_v31 }
  0x2c   :  { %1438 = vmatprep.mubr.f32.mxu1 %v162_v43  ;;  %1777 = vmatpush3.bf16.msra.mxu0 %v1774_v62  ;;  %v211_v62 = vand.u32 4294901760, %v210_v33  ;;  %v252_v33 = vsub.f32 %v2203_v29, %v251_v31  ;;  %v1694_v43 = vpack.c.bf16 %v246_v20, %v239_v15 }
  0x2d   :  { %1578 = vmatprep.mubr.f32.mxu0 %v2147_v9  ;;  %v172_v1 = vand.u32 4294901760, %v171_v57  ;;  %1779 = vmatprep.subr.bf16.mxu0 %v1778_v32 }
  0x2e   :  { %v1686_v22 = vpack.c.bf16 %v218_v8, %v211_v62  ;;  %v253_v51 = vand.u32 4294901760, %v252_v33 }
  0x2f   :  { %1439 = vmatmul.mubr.f32.vlgmr.msra.gmra.mrb[0].mxu1 %v172_v1 }
  0x30   :  { %1681 = vmatpush3.bf16.msra.mxu1 %v1678_v63  ;;  %1781 = vmatpush3.bf16.msra.mxu0 %v1778_v32  ;;  %v2223_v63 = vsub.f32 %v2059_v40, %v117_v45  ;;  %v1690_v32 = vpack.c.bf16 %v232_v4, %v225_v3  ;;  %v2233_v40 = vsub.f32 %v2071_v46, %v120_v56 }
  0x31   :  { %1683 = vmatprep.subr.bf16.mxu1 %v1682_v47  ;;  %1783 = vmatprep.subr.bf16.mxu0 %v1782_v55  ;;  %v2238_v45 = vsub.f32 %v2085_v50, %v123_v60  ;;  %v1698_v50 = vpack.c.bf16 %v260_v53, %v253_v51  ;;  %v1710_v3 = vpack.c.bf16 %v2061_v42, %v2041_v37  ;;  %v763_v42 = vld [vmem:[%s2303_s2] sm:$0xff]  ;;  %s1899_s2 = smov [#allocation2]  }
  0x32   :  { %1473 = vmatprep.mubr.f32.mxu1 %v2147_v9  ;;  %v272_v44 = vand.u32 4294901760, %v2223_v63  ;;  %v279_v46 = vand.u32 4294901760, %v2233_v40  ;;  %v1714_v4 = vpack.c.bf16 %v2130_v23, %v2125_v58  ;;  %v1718_v37 = vpack.c.bf16 %v2145_v5, %v2140_v6  ;;  %s1269_s21 = sshll.u32 %s1899_s2, 4  ;;  %s1270_s21 = int_to_ptr.vmem [resolvable:$true] %s1269_s21 }
  0x33   :  { %v286_v56 = vand.u32 4294901760, %v2238_v45  ;;  %s1875_s22 = scalar_lea.vmem %s1270_s21, 256  ;;  %p1880_p1 = scmp.lt.s32.totalorder %s1270_s21, %s1270_s21 }
  0x34   :  { %1685 = vmatpush3.bf16.msra.mxu1 %v1682_v47  ;;  %1785 = vmatpush3.bf16.msra.mxu0 %v1782_v55  ;;  %v266_v55 = vsub.f32 %v2218_v25, %v265_v39  ;;  %v273_v57 = vsub.f32 %v2223_v63, %v272_v44  ;;  %v1798_v60 = vpack.c.bf16 %v272_v44, %v265_v39  ;;  %p1876_p0 = scmp.ne.s32.totalorder %s1270_s21, %s1875_s22  ;;  %p1881_p2 = scmp.lt.s32.totalorder %s1875_s22, %s1875_s22 }
  0x35   :  { %1687 = vmatprep.subr.bf16.mxu1 %v1686_v22  ;;  %1787 = vmatprep.subr.bf16.mxu0 %v1786_v52  ;;  %v280_v26 = vsub.f32 %v2233_v40, %v279_v46  ;;  %v287_v24 = vsub.f32 %v2238_v45, %v286_v56  ;;  %v1802_v47 = vpack.c.bf16 %v286_v56, %v279_v46 }
  0x36   :  { %v267_v61 = vand.u32 4294901760, %v266_v55  ;;  %v274_v21 = vand.u32 4294901760, %v273_v57  ;;  %p1882_p3 = por %p1881_p2, %p1880_p1 }
  0x37   :  { %v281_v62 = vand.u32 4294901760, %v280_v26  ;;  %v288_v8 = vand.u32 4294901760, %v287_v24 }
  0x38   :  { %1689 = vmatpush3.bf16.msra.mxu1 %v1686_v22  ;;  %1789 = vmatpush3.bf16.msra.mxu0 %v1786_v52  ;;  %v1702_v1 = vpack.c.bf16 %v274_v21, %v267_v61  ;;  %p1883_p4 = pnand %p1882_p3, %p1876_p0 }
  0x39   :  { %1691 = vmatprep.subr.bf16.mxu1 %v1690_v32  ;;  %1791 = vmatprep.subr.bf16.mxu0 %v1790_v14  ;;  %v1706_v52 = vpack.c.bf16 %v288_v8, %v281_v62 }
  0x3c   :  { %1693 = vmatpush3.bf16.msra.mxu1 %v1690_v32  ;;  %1793 = vmatpush3.bf16.msra.mxu0 %v1790_v14 }
  0x3d   :  { %1695 = vmatprep.subr.bf16.mxu1 %v1694_v43  ;;  %1795 = vmatprep.subr.bf16.mxu0 %v1794_v48 }
  0x40   :  { %1697 = vmatpush3.bf16.msra.mxu1 %v1694_v43  ;;  %1797 = vmatpush3.bf16.msra.mxu0 %v1794_v48 }
  0x41   :  { %1699 = vmatprep.subr.bf16.mxu1 %v1698_v50  ;;  %1799 = vmatprep.subr.bf16.mxu0 %v1798_v60 }
  0x44   :  { %1701 = vmatpush3.bf16.msra.mxu1 %v1698_v50  ;;  %1801 = vmatpush3.bf16.msra.mxu0 %v1798_v60 }
  0x45   :  { %1703 = vmatprep.subr.bf16.mxu1 %v1702_v1  ;;  %1803 = vmatprep.subr.bf16.mxu0 %v1802_v47 }
  0x48   :  { %1705 = vmatpush3.bf16.msra.mxu1 %v1702_v1  ;;  %1805 = vmatpush3.bf16.msra.mxu0 %v1802_v47 }
  0x49   :  { %1707 = vmatprep.subr.bf16.mxu1 %v1706_v52  ;;  %1807 = vmatprep.subr.bf16.mxu0 %v1950_v10 }
  0x4b   :  { %1579 = vmatmul.mubr.f32.vlgmr.msra.gmra.mrb[0].mxu0 %v2172_v17 }
  0x4c   :  { %1709 = vmatpush3.bf16.msra.mxu1 %v1706_v52  ;;  %1809 = vmatpush3.bf16.msra.mxu0 %v1950_v10  ;;  %v1722_v10 = vpack.c.bf16 %v2167_v12, %v2162_v11 }
  0x4d   :  { %1711 = vmatprep.subr.bf16.mxu1 %v1710_v3  ;;  %1811 = vmatprep.subr.bf16.mxu0 %v1958_v13 }
  0x4e   :  { %1613 = vmatprep.mubr.f32.mxu0 %v2147_v9 }
  0x4f   :  { %1474 = vmatmul.mubr.f32.vlgmr.msra.gmra.mrb[0].mxu1 %v2172_v17 }
  0x50   :  { %1713 = vmatpush3.bf16.msra.mxu1 %v1710_v3  ;;  %1813 = vmatpush3.bf16.msra.mxu0 %v1958_v13  ;;  %v1726_v13 = vpack.c.bf16 %v2192_v27, %v2187_v41 }
  0x51   :  { %1715 = vmatprep.subr.bf16.mxu1 %v1714_v4  ;;  %1815 = vmatprep.subr.bf16.mxu0 %v1988_v18 }
  0x52   :  { %1508 = vmatprep.mubr.f32.mxu1 %v2156_v7 }
  0x54   :  { %1717 = vmatpush3.bf16.msra.mxu1 %v1714_v4  ;;  %1817 = vmatpush3.bf16.msra.mxu0 %v1988_v18  ;;  %v1730_v18 = vpack.c.bf16 %v2208_v2, %v2203_v29 }
  0x55   :  { %1719 = vmatprep.subr.bf16.mxu1 %v1718_v37  ;;  %1819 = vmatprep.subr.bf16.mxu0 %v2021_v28 }
  0x58   :  { %1721 = vmatpush3.bf16.msra.mxu1 %v1718_v37  ;;  %1821 = vmatpush3.bf16.msra.mxu0 %v2021_v28  ;;  %v1734_v28 = vpack.c.bf16 %v2223_v63, %v2218_v25 }
  0x59   :  { %1723 = vmatprep.subr.bf16.mxu1 %v1722_v10  ;;  %1823 = vmatprep.subr.bf16.mxu0 %v2049_v38 }
  0x5c   :  { %1725 = vmatpush3.bf16.msra.mxu1 %v1722_v10  ;;  %1825 = vmatpush3.bf16.msra.mxu0 %v2049_v38  ;;  %v1738_v38 = vpack.c.bf16 %v2238_v45, %v2233_v40 }
  0x5d   :  { %1727 = vmatprep.subr.bf16.mxu1 %v1726_v13  ;;  %1827 = vmatprep.subr.bf16.mxu0 %v2080_v49 }
  0x60   :  { %1729 = vmatpush3.bf16.msra.mxu1 %v1726_v13  ;;  %1829 = vmatpush3.bf16.msra.mxu0 %v2080_v49  ;;  %v772_v49 = vand.u32 4294901760, %v763_v42 }
  0x61   :  { %1731 = vmatprep.subr.bf16.mxu1 %v1730_v18  ;;  %1831 = vmatprep.subr.bf16.mxu0 %v2098_v59 }
  0x64   :  { %1733 = vmatpush3.bf16.msra.mxu1 %v1730_v18  ;;  %1833 = vmatpush3.bf16.msra.mxu0 %v2098_v59  ;;  %v859_v59 = vsub.f32 %v763_v42, %v772_v49 }
  0x65   :  { %1735 = vmatprep.subr.bf16.mxu1 %v1734_v28  ;;  %1835 = vmatprep.subr.bf16.mxu0 %v2115_v16 }
  0x66   :  { %v860_v58 = vand.u32 4294901760, %v859_v59 }
  0x68   :  { %1737 = vmatpush3.bf16.msra.mxu1 %v1734_v28  ;;  %1837 = vmatpush3.bf16.msra.mxu0 %v2115_v16  ;;  %v861_v23 = vsub.f32 %v859_v59, %v860_v58 }
  0x69   :  { %1739 = vmatprep.subr.bf16.mxu1 %v1738_v38  ;;  %1616 = vmatprep.subr.mxu0 %v772_v49 }
  0x6a   :  { %v862_v16 = vand.u32 4294901760, %v861_v23 }
  0x6b   :  { %1614 = vmatmul.mubr.f32.vlgmr.msra.gmra.mrb[0].mxu0 %v2172_v17 }
  0x6c   :  { %1741 = vmatpush3.bf16.msra.mxu1 %v1738_v38  ;;  %1617 = vmatpush3.msra.mxu0 %v772_v49 }
  0x6d   :  { %1631 = vmatprep.subr.mxu1 %v772_v49  ;;  %1621 = vmatprep.subr.mxu0 %v862_v16 }
  0x6f   :  { %1509 = vmatmul.mubr.f32.vlgmr.msra.gmra.mrb[0].mxu1 %v2178_v19 }
  0x70   :  { %1632 = vmatpush3.msra.mxu1 %v772_v49 }
  0x71   :  { %1636 = vmatprep.subr.mxu1 %v860_v58 }
 0x13e   :  { %v1615_v6 = vpop.f32.mrb[0].mxu0 }
 0x13f   :  { %v751_v5 = vpop.f32.mrb[1].mxu0 }
 0x142   :  { %v1510_v9 = vpop.f32.mrb[0].mxu1 }
 0x143   :  { %v1838_v7 = vadd.f32 1e-12, %v1510_v9  ;;  %v435_v11 = vpop.f32.mrb[1].mxu1 }
 0x144   :  { %v1840_v12 = vadd.f32 1e-12, %v435_v11 }
 0x145   :  { %v1839_v17 = vadd.f32 %v1838_v7, %v1615_v6 }
 0x146   :  { %v1841_v19 = vadd.f32 %v1840_v12, %v751_v5 }
 0x147   :  { %1871 = vrsqrt.f32 %v1839_v17 }
 0x148   :  { %1873 = vrsqrt.f32 %v1841_v19 }
 0x151   :  { %v1872_v41 = vpop.eup %1871 }
 0x152   :  { %v1874_v27 = vpop.eup %1873  ;;  %v769_v29 = vsel %vm764_vm4, %v1872_v41, 0 }
 0x153   :  { %v766_v2 = vsel %vm764_vm4, %v1874_v27, 0  ;;  %v847_v30 = vand.u32 4294901760, %v769_v29 }
 0x154   :  { %v837_v35 = vand.u32 4294901760, %v766_v2 }
 0x155   :  { %v848_v31 = vsub.f32 %v769_v29, %v847_v30 }
 0x156   :  { %v838_v36 = vsub.f32 %v766_v2, %v837_v35 }
 0x157   :  { %v849_v22 = vand.u32 4294901760, %v848_v31 }
 0x158   :  { %v839_v25 = vand.u32 4294901760, %v838_v36 }
 0x159   :  { %v850_v63 = vsub.f32 %v848_v31, %v849_v22 }
 0x15a   :  { %1633 = vmatprep.mubr.f32.mxu1 %v839_v25  ;;  %v840_v32 = vsub.f32 %v838_v36, %v839_v25 }
 0x15b   :  { %1634 = vmatmul.mubr.f32.vlgmr.msra.gmra.mrb[2].mxu1 %v849_v22  ;;  %v851_v15 = vand.u32 4294901760, %v850_v63 }
 0x15c   :  { %1638 = vmatprep.mubr.f32.mxu1 %v837_v35  ;;  %v841_v14 = vand.u32 4294901760, %v840_v32  ;;  %1637 = vmatpush3.msra.mxu1 %v860_v58 }
 0x15d   :  { %1641 = vmatprep.subr.mxu1 %v772_v49 }
 0x15e   :  { %1618 = vmatprep.mubr.f32.mxu0 %v841_v14 }
 0x15f   :  { %1619 = vmatmul.mubr.f32.vlgmr.msra.gmra.mrb[2].mxu0 %v851_v15 }
 0x160   :  { %1622 = vmatpush3.msra.mxu0 %v862_v16  ;;  %1623 = vmatprep.mubr.f32.mxu0 %v837_v35 }
 0x161   :  { %1626 = vmatprep.subr.mxu0 %v859_v59 }
 0x163   :  { %1639 = vmatmul.mubr.f32.vlgmr.msra.gmra.mrb[2].mxu1 %v847_v30 }
 0x164   :  { %1643 = vmatprep.mubr.f32.mxu1 %v837_v35  ;;  %1642 = vmatpush3.msra.mxu1 %v772_v49 }
 0x167   :  { %1624 = vmatmul.mubr.f32.vlgmr.msra.gmra.mrb[2].mxu0 %v847_v30 }
 0x168   :  { %1627 = vmatpush3.msra.mxu0 %v859_v59  ;;  %1628 = vmatprep.mubr.f32.mxu0 %v838_v36 }
 0x16b   :  { %1644 = vmatmul.mubr.f32.vlgmr.msra.gmra.mrb[2].mxu1 %v847_v30 }
 0x16f   :  { %1629 = vmatmul.mubr.f32.vlgmr.msra.gmra.mrb[2].mxu0 %v848_v31 }
 0x23e   :  { %v1645_v20 = vpop.f32.mrb[2].mxu1 }
 0x23f   :  { %v1250_v33 = vpop.f32.mrb[3].mxu1 }
 0x242   :  { %v1630_v34 = vpop.f32.mrb[2].mxu0 }
 0x243   :  { %v1842_v39 = vadd.f32 %v1645_v20, %v1630_v34  ;;  %v1009_v44 = vpop.f32.mrb[3].mxu0 }
 0x244   :  { %v1843_v40 = vadd.f32 %v1250_v33, %v1009_v44 }
 0x245   :  { %v1261_v45 = vmul.f32 %v1842_v39, %v2149_v0 }
 0x246   :  { %v1260_v43 = vmul.f32 %v1843_v40, %v2120_v54 }
 0x247   :  { %1263 = vst [vmem:[#allocation2 + $0x8] sm:$0xff] %v1261_v45 }
 0x248   :  { %1262 = vst [vmem:[#allocation2] sm:$0xff] %v1260_v43 }
 0x249   :  { %1886 = shalt.err (!%p1883_p4)
}
 0x24a   :  { %s1887_s25 = scalar_lea.hbm %s2304_s3, 256 }
 0x24b   :  { %p1888_p5 = scmp.ne.s32.totalorder %s2304_s3, %s1887_s25  ;;  %p1891_p6 = scmp.lt.u32.totalorder %s1887_s25, %s2304_s3 }
 0x24d   :  { %p1893_p7 = pnand %p1891_p6, %p1888_p5 }
 0x24f   :  { %1896 = shalt.err (!%p1893_p7)
}
 0x250   :  { %s1900_s30 = smov 128   ;;  %s1901_s4 = smov 8  }
 0x251   :  { %1275 = dma.vmem_to_hbm [thread:$0]  %s1270_s21, 256, %s2304_s3, [#allocation3], %s1900_s30, %s1900_s30, %s1901_s4  }
 0x252   :  { %1897 = dma.done.wait [#allocation3], 256  }
 0x253   :  { %1898 = vsyncadd [#allocation3], 4294967040 }
 0x254   :  { %1279 = vsyncpa [#allocation3], 1 }

</bundles_post_ra>
